<compile_context>
chip_gen: v7x
topology: tpu7x:2x2x1
jax: 0.10.0
libtpu: 0.0.40
codegen_flags: <defaults>
</compile_context>

<pallas_src>
import functools

import jax
import jax.numpy as jnp
from jax import lax
from jax.experimental import pallas as pl
from jax.experimental.pallas import tpu as pltpu


def _choose_tile_b(B: int, K: int) -> int:
    """Pick a lane-aligned batch tile so 2x double-buffered tiles fit scoped VMEM."""
    budget = 12 * 1024 * 1024                      # headroom under v5e's 16 MiB default
    max_by_vmem = budget // (2 * (K + 2) * 4)      # (top + label + acc) tiles, x2 buffers
    tile = min(4096, max_by_vmem)                  # big tiles amortize ~0.35us/step overhead
    b_floor = (B // 128) * 128 if B >= 128 else 128
    tile = min(tile, b_floor)
    tile = max(128, (tile // 128) * 128)
    return int(tile)


def _make_rank_loss_kernel(B: int, K: int, tile_b: int, num_tiles: int,
                           inv_max_rank: float):
    def kernel(top_ref, labels_ref, out_ref, acc_ref):
        i = pl.program_id(0)

        # Init the resident accumulators on the first grid step.
        @pl.when(i == 0)
        def _init():
            acc_ref[...] = jnp.zeros_like(acc_ref)
            out_ref[...] = jnp.zeros_like(out_ref)

        top = top_ref[...]           # (K, TILE_B) int32, batch on lanes
        labels = labels_ref[...]     # (1, TILE_B) int32 -> broadcasts over K sublanes

        matches = top == labels                                   # (K, TILE_B)
        pos = lax.broadcasted_iota(jnp.int32, (K, tile_b), 0)     # candidate position
        sentinel = jnp.int32(K)                                   # "not found" marker

        # First matching position per column (sublane min-reduce, cheap for small K).
        rank = jnp.min(jnp.where(matches, pos, sentinel), axis=0, keepdims=True)  # (1, TILE_B)
        found = rank < sentinel

        loss = jnp.where(found,
                         rank.astype(jnp.float32) * jnp.float32(inv_max_rank),
                         jnp.float32(1.0))                        # (1, TILE_B)

        # Mask lanes belonging to padded rows of the final partial tile, then
        # accumulate per-lane partial sums (VPU only; no per-step cross-lane reduce).
        col = i * tile_b + lax.broadcasted_iota(jnp.int32, (1, tile_b), 1)
        valid = col < jnp.int32(B)
        acc_ref[...] += jnp.where(valid, loss, jnp.float32(0.0))

        # Finalize: one cross-lane reduce + divide by the true batch size.
        @pl.when(i == num_tiles - 1)
        def _finalize():
            out_ref[...] = (jnp.sum(acc_ref[...], axis=1, keepdims=True)
                            * jnp.float32(1.0 / B))

    return kernel


@functools.partial(jax.jit, static_argnames=("max_rank", "tile_b"))
def custom_rank_loss(top_indices, true_labels, max_rank: int = 1000, tile_b=None):
    """top_indices: (B, K) int, true_labels: (B,) int -> scalar float32 mean rank loss."""
    top_indices = jnp.asarray(top_indices)
    true_labels = jnp.asarray(true_labels)
    B, K = top_indices.shape

    # Lane-dense layout: batch on lanes (last dim), candidate list K on sublanes.
    # (int64 labels from PyTorch are index-valued, so the int32 cast is lossless here.)
    top_t = jnp.transpose(top_indices.astype(jnp.int32))        # (K, B)
    labels_row = true_labels.astype(jnp.int32).reshape(1, B)    # (1, B)

    if tile_b is None:
        tile_b = _choose_tile_b(B, K)
    num_tiles = (B + tile_b - 1) // tile_b

    grid_spec = pltpu.PrefetchScalarGridSpec(
        num_scalar_prefetch=0,
        grid=(num_tiles,),
        in_specs=[
            pl.BlockSpec((K, tile_b), lambda i: (0, i)),
            pl.BlockSpec((1, tile_b), lambda i: (0, i)),
        ],
        out_specs=pl.BlockSpec((1, 1), lambda i: (0, 0)),
        scratch_shapes=[pltpu.VMEM((1, tile_b), jnp.float32)],
    )

    cost = pl.CostEstimate(
        flops=2 * B * K,
        transcendentals=0,
        bytes_accessed=B * K * 4 + B * 4 + 4,
    )

    out = pl.pallas_call(
        _make_rank_loss_kernel(B, K, tile_b, num_tiles, 1.0 / float(max_rank)),
        out_shape=jax.ShapeDtypeStruct((1, 1), jnp.float32),
        grid_spec=grid_spec,
        compiler_params=pltpu.CompilerParams(
            dimension_semantics=("arbitrary",)),   # accumulator axis must be arbitrary
        cost_estimate=cost,
    )(top_t, labels_row)
    return out[0, 0]


if __name__ == "__main__":
    key = jax.random.PRNGKey(0)
    B, K, MAX_RANK = 200, 16, 1000   # small, exercises a partial final tile (200 % 128 != 0)

    k1, k2 = jax.random.split(key)
    # candidate index lists (values in [0, 500))
    top_indices = jax.random.randint(k1, (B, K), 0, 500, dtype=jnp.int32)

    # true labels: mix of "found" (taken from the row) and "not found" (impossible value)
    gather_pos = jnp.arange(B) % K
    row_vals = top_indices[jnp.arange(B), gather_pos]
    true_labels = jnp.where(jnp.arange(B) % 3 == 0, jnp.int32(10_000), row_vals)

    result = custom_rank_loss(top_indices, true_labels, max_rank=MAX_RANK)
    result = jax.block_until_ready(result)

    # pure-JAX reference (first-match, 0-based rank, not-found -> 1.0)
    pos = jnp.arange(K)[None, :]
    matches = top_indices == true_labels[:, None]
    rank = jnp.min(jnp.where(matches, pos, K), axis=1)
    ref = jnp.mean(jnp.where(rank < K, rank.astype(jnp.float32) / MAX_RANK, 1.0))

    assert jnp.allclose(result, ref, atol=1e-6), (result, ref)
    print("KERNEL_OK")
</pallas_src>

<mosaic_0001>
module attributes {stable_mosaic.version = 11 : i64} {
  func.func @kernel(%arg0: i32, %arg1: memref<16x128xi32, #tpu.memory_space<vmem>>, %arg2: memref<1x128xi32, #tpu.memory_space<vmem>>, %arg3: memref<1x1xf32, #tpu.memory_space<vmem>>, %arg4: memref<1x128xf32, #tpu.memory_space<vmem>>) attributes {dimension_semantics = [#tpu.dimension_semantics<arbitrary>], iteration_bounds = array<i64: 2>, scalar_prefetch = 0 : i64, scratch_operands = 1 : i64, tpu.core_type = #tpu.core_type<tc>, window_params = [{transform_indices = @transform_0, window_bounds = array<i64: 16, 128>}, {transform_indices = @transform_1, window_bounds = array<i64: 1, 128>}, {pipeline_mode = #tpu.pipeline_mode<synchronous>, transform_indices = @transform_2, window_bounds = array<i64: 1, 1>}]} {
    %c0_i32 = arith.constant 0 : i32
    %0 = arith.cmpi eq, %arg0, %c0_i32 : i32
    %1 = arith.extui %0 : i1 to i32
    %c0_i32_0 = arith.constant 0 : i32
    %2 = arith.cmpi ne, %1, %c0_i32_0 : i32
    scf.if %2 {
      %cst_13 = arith.constant 0.000000e+00 : f32
      %33 = vector.broadcast %cst_13 : f32 to vector<1x128xf32>
      %c0_14 = arith.constant 0 : index
      %c0_15 = arith.constant 0 : index
      %34 = vector.load %arg4[%c0_14, %c0_15] : memref<1x128xf32, #tpu.memory_space<vmem>>, vector<1x128xf32>
      tpu.vector_store %arg4[%c0_14, %c0_15], %33 {strides = array<i32>} : memref<1x128xf32, #tpu.memory_space<vmem>>, vector<1x128xf32>,
      %cst_16 = arith.constant 0.000000e+00 : f32
      %35 = vector.broadcast %cst_16 : f32 to vector<1x1xf32>
      %c0_17 = arith.constant 0 : index
      %c0_18 = arith.constant 0 : index
      %36 = vector.load %arg3[%c0_17, %c0_18] : memref<1x1xf32, #tpu.memory_space<vmem>>, vector<1x1xf32>
      tpu.vector_store %arg3[%c0_17, %c0_18], %35 {strides = array<i32>} : memref<1x1xf32, #tpu.memory_space<vmem>>, vector<1x1xf32>,
    } else {
    }
    %c0 = arith.constant 0 : index
    %c0_1 = arith.constant 0 : index
    %3 = vector.load %arg1[%c0, %c0_1] : memref<16x128xi32, #tpu.memory_space<vmem>>, vector<16x128xi32>
    %c0_2 = arith.constant 0 : index
    %c0_3 = arith.constant 0 : index
    %4 = vector.load %arg2[%c0_2, %c0_3] : memref<1x128xi32, #tpu.memory_space<vmem>>, vector<1x128xi32>
    %5 = vector.broadcast %4 : vector<1x128xi32> to vector<16x128xi32>
    %6 = arith.cmpi eq, %3, %5 : vector<16x128xi32>
    %7 = tpu.iota {dimensions = array<i32: 0>} : vector<16x128xi32>
    %c16_i32 = arith.constant 16 : i32
    %8 = vector.broadcast %c16_i32 : i32 to vector<16x128xi32>
    %9 = arith.select %6, %7, %8 : vector<16x128xi1>, vector<16x128xi32>
    %cst = arith.constant dense<2147483647> : vector<128xi32>
    %10 = vector.multi_reduction <minsi>, %9, %cst [0] : vector<16x128xi32> to vector<128xi32>
    %11 = vector.shape_cast %10 : vector<128xi32> to vector<1x128xi32>
    %c16_i32_4 = arith.constant 16 : i32
    %12 = vector.broadcast %c16_i32_4 : i32 to vector<1x128xi32>
    %13 = arith.cmpi slt, %11, %12 : vector<1x128xi32>
    %14 = arith.sitofp %11 : vector<1x128xi32> to vector<1x128xf32>
    %cst_5 = arith.constant 1.000000e-03 : f32
    %15 = vector.broadcast %cst_5 : f32 to vector<1x128xf32>
    %16 = arith.mulf %14, %15 : vector<1x128xf32>
    %cst_6 = arith.constant 1.000000e+00 : f32
    %17 = vector.broadcast %cst_6 : f32 to vector<1x128xf32>
    %18 = arith.select %13, %16, %17 : vector<1x128xi1>, vector<1x128xf32>
    %c128_i32 = arith.constant 128 : i32
    %19 = arith.muli %arg0, %c128_i32 : i32
    %20 = tpu.iota {dimensions = array<i32: 1>} : vector<1x128xi32>
    %21 = vector.broadcast %19 : i32 to vector<1x128xi32>
    %22 = arith.addi %21, %20 : vector<1x128xi32>
    %c200_i32 = arith.constant 200 : i32
    %23 = vector.broadcast %c200_i32 : i32 to vector<1x128xi32>
    %24 = arith.cmpi slt, %22, %23 : vector<1x128xi32>
    %c0_7 = arith.constant 0 : index
    %c0_8 = arith.constant 0 : index
    %25 = vector.load %arg4[%c0_7, %c0_8] : memref<1x128xf32, #tpu.memory_space<vmem>>, vector<1x128xf32>
    %cst_9 = arith.constant 0.000000e+00 : f32
    %26 = vector.broadcast %cst_9 : f32 to vector<1x128xf32>
    %27 = arith.select %24, %18, %26 : vector<1x128xi1>, vector<1x128xf32>
    %28 = arith.addf %25, %27 : vector<1x128xf32>
    %c0_10 = arith.constant 0 : index
    %c0_11 = arith.constant 0 : index
    %29 = vector.load %arg4[%c0_10, %c0_11] : memref<1x128xf32, #tpu.memory_space<vmem>>, vector<1x128xf32>
    tpu.vector_store %arg4[%c0_10, %c0_11], %28 {strides = array<i32>} : memref<1x128xf32, #tpu.memory_space<vmem>>, vector<1x128xf32>,
    %c1_i32 = arith.constant 1 : i32
    %30 = arith.cmpi eq, %arg0, %c1_i32 : i32
    %31 = arith.extui %30 : i1 to i32
    %c0_i32_12 = arith.constant 0 : i32
    %32 = arith.cmpi ne, %31, %c0_i32_12 : i32
    scf.if %32 {
      %c0_13 = arith.constant 0 : index
      %c0_14 = arith.constant 0 : index
      %33 = vector.load %arg4[%c0_13, %c0_14] : memref<1x128xf32, #tpu.memory_space<vmem>>, vector<1x128xf32>
      %cst_15 = arith.constant dense<0.000000e+00> : vector<1xf32>
      %34 = vector.multi_reduction <add>, %33, %cst_15 [1] : vector<1x128xf32> to vector<1xf32>
      %35 = vector.shape_cast %34 : vector<1xf32> to vector<1x1xf32>
      %cst_16 = arith.constant 5.000000e-03 : f32
      %36 = vector.broadcast %cst_16 : f32 to vector<1x1xf32>
      %37 = arith.mulf %35, %36 : vector<1x1xf32>
      %c0_17 = arith.constant 0 : index
      %c0_18 = arith.constant 0 : index
      %38 = vector.load %arg3[%c0_17, %c0_18] : memref<1x1xf32, #tpu.memory_space<vmem>>, vector<1x1xf32>
      tpu.vector_store %arg3[%c0_17, %c0_18], %37 {strides = array<i32>} : memref<1x1xf32, #tpu.memory_space<vmem>>, vector<1x1xf32>,
    } else {
    }
    return
  }
  func.func @transform_0(%arg0: i32) -> (i32, i32) {
    %c0_i32 = arith.constant 0 : i32
    %c0_i32_0 = arith.constant 0 : i32
    return %c0_i32, %arg0 : i32, i32
  }
  func.func @transform_1(%arg0: i32) -> (i32, i32) {
    %c0_i32 = arith.constant 0 : i32
    %c0_i32_0 = arith.constant 0 : i32
    return %c0_i32, %arg0 : i32, i32
  }
  func.func @transform_2(%arg0: i32) -> (i32, i32) {
    %c0_i32 = arith.constant 0 : i32
    %c0_i32_0 = arith.constant 0 : i32
    %c0_i32_1 = arith.constant 0 : i32
    return %c0_i32, %c0_i32_0 : i32, i32
  }
}

</mosaic_0001>

<bundles_post_ra>
// kernel: custom_rank_loss.1
= control target key start
LH: loop header
LB: loop body
LE: loop exit
PB: predicated region body
PF: predicated region fallthrough
CT: control target
= control target key end

     0   :  { %7 = vsyncpa [#allocation4], 0  ;;  %s601_s0 = inlined_call_operand.hbm [shape: s32[16,200], index: 0, kind: input, shape index: {}]   ;;  %s602_s1 = inlined_call_operand.vmem [shape: s32[1,200], index: 1, kind: input, shape index: {}]   ;;  %s603_s2 = inlined_call_operand.hbm [shape: f32[1,1], index: 2, kind: output, shape index: {}]  }
   0x1   :  { %9 = vsyncpa [#allocation4 + $0x1], 0 }
   0x2   :  { %10 = vsyncpa [#allocation5], 0  ;;  %s469_s9 = smov 0   ;;  %s471_s10 = smov 0  }
   0x3   :  { %s473_s11 = smov 0   ;;  %s475_s12 = smov 0  }
   0x4 LB: > { %s488_s13 = sadd.s32 4294967295, %s446_s12   ;;  %s491_s14 = sadd.s32 1, %s446_s12   ;;  %s446_s12 = sphi %s475_s12, %s609_s12   ;;  %s442_s11 = sphi %s473_s11, %s608_s11   ;;  %s438_s10 = sphi %s471_s10, %s607_s10   ;;  %s434_s9 = sphi %s469_s9, %s606_s9  }
   0x5   : > { %s20_s15 = ssub.s32 %s446_s12, %s491_s14  ;;  %s23_s16 = sadd.s32 1, %s442_s11 }
   0x6   : > { %p21_p0 = scmp.eq.s32.totalorder %s20_s15, 0  ;;  %p30_p1 = scmp.ne.s32.totalorder %s442_s11, %s438_s10 }
   0x7   : > { %p31_p2 = scmp.eq.s32.totalorder %s446_s12, 0  ;;  %p36_p3 = scmp.ne.s32.totalorder %s438_s10, %s434_s9 }
   0x8   : > { %s501_s17 = scalar_select %p21_p0, %s442_s11, %s23_s16  }
   0x9   : > { %p32_p4 = por %p31_p2, %p30_p1  ;;  %p37_p5 = scmp.eq.s32.totalorder %s488_s13, 0 }
   0xa   : > { %p312_p6 = scmp.lt.s32.totalorder %s446_s12, 2  ;;  %s107_s19 = sand.u32 1, %s442_s11  }
   0xb   : > { %p505_p7 = por %p37_p5, %p36_p3  ;;  %s290_s20 = sshll.u32 %s107_s19, 4 }
   0xc   : > { %s291_s21 = sshll.u32 %s446_s12, 7  ;;  %s111_s25 = scalar_lea.vmem [#allocation3], %s290_s20 }
   0xd   : > { %s514_s24 = scalar_lea.hbm %s601_s0, %s291_s21  ;;  %s117_s26 = sshll.u32 %s111_s25, 4  ;;  %s516_s26 = int_to_ptr.vmem [resolvable:$true] %s117_s26 }
   0xe   : > { %p518_p8 = pnand %p312_p6, %p32_p4  ;;  %s522_s28 = scalar_lea.sflag [#allocation4], %s107_s19 }
   0xf   : > { %s352_s29 = scalar_lea.hbm %s514_s24, 256  ;;  %s357_s4 = scalar_lea.hbm %s601_s0, 512 }
  0x10   : > { %p353_p9 = scmp.ne.s32.totalorder %s514_s24, %s352_s29  ;;  %p354_p10 = pneg %p518_p8 }
  0x11   : > { %p358_p13 = scmp.lt.u32.totalorder %s514_s24, %s601_s0  ;;  %p359_p0 = scmp.lt.u32.totalorder %s357_s4, %s352_s29 }
  0x12   : > { %p355_p11 = pnand %p354_p10, %p353_p9  ;;  %p361_p2 = scmp.lt.u32.totalorder %s352_s29, %s514_s24 }
  0x13   : > { %p360_p1 = por %p359_p0, %p358_p13 }
  0x14   : > { %p356_p12 = pneg %p355_p11 }
  0x15   : > { %p362_p3 = por %p361_p2, %p360_p1 }
  0x17   : > { %p363_p4 = pnand %p362_p3, %p356_p12 }
  0x19   : > { %366 = shalt.err (!%p363_p4)
}
  0x1a   : > { %s367_s7 = scalar_lea.vmem %s516_s26, 256  ;;  %s448_s8 = smov [#allocation3]  }
  0x1b   : > { %p368_p5 = scmp.ne.s32.totalorder %s516_s26, %s367_s7  ;;  %s372_s9 = sshll.u32 %s448_s8, 4  ;;  %s373_s9 = int_to_ptr.vmem [resolvable:$false] %s372_s9 }
  0x1c   : > { %s374_s15 = scalar_lea.vmem %s373_s9, 512  ;;  %p375_p11 = scmp.lt.s32.totalorder %s516_s26, %s373_s9 }
  0x1d   : > { %p370_p6 = pnand %p368_p5, %p354_p10  ;;  %p376_p13 = scmp.lt.s32.totalorder %s374_s15, %s367_s7 }
  0x1f   : > { %p371_p9 = pneg %p370_p6  ;;  %p377_p0 = por %p376_p13, %p375_p11 }
  0x21   : > { %p378_p1 = pnand %p377_p0, %p371_p9 }
  0x23   : > { %381 = shalt.err (!%p378_p1)
}
  0x24   : > { %s449_s16 = smov 256   ;;  %s450_s19 = smov 128  }
  0x25   : > { %s451_s20 = smov 8   ;;  %p292_p10 = scmp.ge.s32.totalorder %s446_s12, 1 }
  0x26   : > { %311 = dma.hbm_to_vmem [thread:$0]  (!%p518_p8), %s514_s24, 256, %s516_s26, %s522_s28, %s449_s16, %s450_s19, %s451_s20  }
  0x27   : > { %p131_p12 = scmp.lt.s32.totalorder %s446_s12, 3 }
  0x29   : > { %p132_p2 = pnand %p292_p10, %p131_p12 }
  0x2a   : > { %s137_s21 = sand.u32 (!%p132_p2), 1, %s438_s10  }
  0x2b   : > { %135 = sbr.rel (%p132_p2) target bundleno = 269 (0x10d), region = 28  ;;  %s293_s22 = sshll.u32 (!%p132_p2), %s137_s21, 4 }
  0x2c   : > { %s138_s23 = scalar_lea.sflag (!%p132_p2), [#allocation4], %s137_s21  ;;  %s141_s25 = scalar_lea.vmem (!%p132_p2), [#allocation3], %s293_s22 }
  0x32   : > { %425 = dma.done.wait (%p505_p7), %s138_s23, 256  }
  0x33   : > { %427 = vsyncadd (%p505_p7), %s138_s23, 4294967040  ;;  %p160_p3 = scmp.lt.s32.totalorder %s488_s13, 1  ;;  %p294_p8 = scmp.ne.s32.totalorder %s488_s13, 0 }
  0x34   : > { %vm168_vm0 = vcmask (!%p294_p8), 0   ;;  %v452_v0 = vmov (!%p294_p8), 0.0  }
  0x35   : > { %s161_s27 = scalar_select %p160_p3, %s488_s13, 1 }
  0x36   : > { %166 = sbr.rel (%p294_p8) target bundleno = 61 (0x3d), region = 36  ;;  %167 = vst [vmem:[#allocation2] sm:$0x1] (!%p294_p8), %v452_v0  ;;  %169 = vst.msk [vmem:[#allocation6] sm:$0x1] (!%p294_p8), %vm168_vm0, %v452_v0 }
  0x37   : > { %s162_s12 = scalar_lea.vmem %s602_s1, %s161_s27 }
  0x3d PF: > { %v170_v1 = vld [vmem:[%s141_s25] sm:$0xff]  ;;  %v171_v2 = vld [vmem:[%s141_s25 + $0x8] sm:$0xff]  ;;  %v179_v4 = vlaneseq  ;;  %s296_s18 = sshll.u32 %s488_s13, 7  ;;  %p297_p7 = scmp.ne.s32.totalorder %s488_s13, 1 }
  0x3e   : > { %v295_v3 = vld [vmem:[%s162_s12] ss:$0 sm:$0xff]  ;;  %v202_v15 = vstv %s296_s18  ;;  %vm214_vm9 = vcmask (!%p297_p7), 1040384   ;;  %vm219_vm10 = vcmask (!%p297_p7), 0  }
  0x3f   : > { %vm177_vm1 = vcmp.eq.s32.totalorder %v170_v1, %v295_v3  ;;  %v180_v5 = vshrl.u32 %v179_v4, 7  ;;  %vm178_vm2 = vcmp.eq.s32.totalorder %v171_v2, %v295_v3  ;;  %v201_v13 = vand.u32 127, %v179_v4  ;;  %v205_v21 = vld [vmem:[#allocation2] sm:$0x1] }
  0x41   : > { %v181_v6 = vadd.s32 8, %v180_v5  ;;  %v182_v7 = vsel %vm177_vm1, %v180_v5, 16  ;;  %v203_v17 = vadd.s32 %v202_v15, %v201_v13 }
  0x43   : > { %v183_v8 = vsel %vm178_vm2, %v181_v6, 16  ;;  %vm204_vm8 = vcmp.lt.s32.totalorder %v203_v17, 200 }
  0x44   : > { %vm184_vm3 = vcmp.lt.s32.totalorder %v182_v7, %v183_v8 }
  0x45   : > { %v185_v9 = vsel %vm184_vm3, %v182_v7, %v183_v8 }
  0x46   : > { %v186_v10 = vrot.slane %v185_v9, 4 }
  0x48   : > { %vm187_vm4 = vcmp.lt.s32.totalorder %v185_v9, %v186_v10 }
  0x49   : > { %v188_v11 = vsel %vm187_vm4, %v185_v9, %v186_v10 }
  0x4a   : > { %v189_v12 = vrot.slane %v188_v11, 2 }
  0x4c   : > { %vm190_vm5 = vcmp.lt.s32.totalorder %v188_v11, %v189_v12 }
  0x4d   : > { %v191_v14 = vsel %vm190_vm5, %v188_v11, %v189_v12 }
  0x4e   : > { %v192_v16 = vrot.slane %v191_v14, 1 }
  0x50   : > { %vm193_vm6 = vcmp.lt.s32.totalorder %v191_v14, %v192_v16 }
  0x51   : > { %v194_v18 = vsel %vm193_vm6, %v191_v14, %v192_v16 }
  0x52   : > { %v196_v19 = vcvt.s32.f32 %v194_v18  ;;  %vm195_vm7 = vcmp.lt.s32.totalorder %v194_v18, 16 }
  0x54   : > { %v197_v20 = vmul.f32 0.001, %v196_v19  ;;  %212 = sbr.rel (%p297_p7) target bundleno = 244 (0xf4), region = 40 }
  0x56   : > { %v198_v22 = vsel %vm195_vm7, %v197_v20, 1.0 }
  0x57   : > { %v206_v23 = vsel %vm204_vm8, %v198_v22, 0.0 }
  0x58   : > { %v207_v24 = vadd.f32 %v206_v23, %v205_v21 }
  0x5a   : > { %208 = vst [vmem:[#allocation2] sm:$0x1] %v207_v24 }
  0x61   : > { %v213_v25 = vld [vmem:[#allocation2] sm:$0x1] }
  0x62   : > { %v215_v26 = vsel %vm214_vm9, %v213_v25, 0.0 }
  0x63   : > { %216 = vadd.xlane.f32.xlu0 %v215_v26 }
  0xf0   : > { %v217_v27 = vpop.xlane.xlu0 %216 }
  0xf1   : > { %v218_v28 = vmul.f32 0.005, %v217_v27 }
  0xf3   : > { %220 = vst.msk [vmem:[#allocation6] sm:$0x1] %vm219_vm10, %v218_v28 }
  0xf4 PF: > { %p313_p4 = scmp.eq.s32.totalorder %s488_s13, 1  ;;  %s453_s28 = smov [#allocation6]  }
  0xf5   : > { %s228_s29 = sshll.u32 %s453_s28, 4  ;;  %s229_s29 = int_to_ptr.vmem [resolvable:$true] %s228_s29 }
  0xf6   : > { %s382_s30 = scalar_lea.vmem %s229_s29, 16  ;;  %s388_s3 = scalar_lea.vmem %s229_s29, 32 }
  0xf7   : > { %p383_p5 = scmp.ne.s32.totalorder %s229_s29, %s382_s30  ;;  %p389_p11 = scmp.lt.s32.totalorder %s229_s29, %s229_s29 }
  0xf8   : > { %p390_p13 = scmp.lt.s32.totalorder %s388_s3, %s382_s30 }
  0xf9   : > { %p384_p6 = pnand %p383_p5, %p313_p4 }
  0xfa   : > { %p391_p0 = por %p390_p13, %p389_p11 }
  0xfb   : > { %p385_p9 = pneg %p384_p6 }
  0xfd   : > { %p392_p1 = pnand %p391_p0, %p385_p9 }
  0xff   : > { %395 = shalt.err (!%p392_p1)
}
 0x100   : > { %s396_s6 = scalar_lea.hbm %s603_s2, 16 }
 0x101   : > { %p397_p10 = scmp.ne.s32.totalorder %s603_s2, %s396_s6  ;;  %p402_p3 = scmp.lt.u32.totalorder %s396_s6, %s603_s2 }
 0x103   : > { %p398_p12 = pnand %p397_p10, %p313_p4 }
 0x105   : > { %p399_p2 = pneg %p398_p12 }
 0x107   : > { %p404_p8 = pnand %p402_p3, %p399_p2 }
 0x109   : > { %407 = shalt.err (!%p404_p8)
}
 0x10a   : > { %305 = dma.vmem_to_hbm [thread:$0]  (%p313_p4), %s229_s29, 16, %s603_s2, [#allocation5]  }
 0x10b   : > { %429 = dma.done.wait (%p313_p4), [#allocation5], 16  }
 0x10c   : > { %431 = vsyncadd (%p313_p4), [#allocation5], 4294967280 }
 0x10d PF: > { %p13_p7 = scmp.ge.s32.totalorder %s491_s14, 4   ;;  %s606_s9 = smov %s438_s10 }
 0x10e   : > { %s607_s10 = smov %s442_s11  ;;  %s608_s11 = smov %s501_s17 }
 0x10f   : > { %s609_s12 = smov %s491_s14  ;;  %15 = sbr.rel (!%p13_p7) target bundleno = 4 (0x4), region = 76 }
 0x116   :  { %241 = vsyncpa [#allocation4], 1 }
 0x117   :  { %243 = vsyncpa [#allocation4 + $0x1], 1 }
 0x118   :  { %244 = vsyncpa [#allocation5], 1 }
 0x119   :  { %246 = vsyncpa [#allocation5 + $0x1], 1 }

</bundles_post_ra>
